<compile_context>
chip_gen: v6e
topology: v6e:2x2x1
jax: 0.10.0
libtpu: 0.0.40
codegen_flags: <defaults>
</compile_context>

<pallas_src>
import math
import functools

import jax
import jax.numpy as jnp
from jax.experimental import pallas as pl
from jax.experimental.pallas import tpu as pltpu


def _round_up(x, m):
    return ((x + m - 1) // m) * m


def _actor_kernel(x_ref, w1_ref, b1_ref, w2_ref, b2_ref, wh_ref, bh_ref,
                  out_ref, *, action_scale, out_size):
    # In-kernel cast of the state tile to the matmul dtype (rides a free VPU
    # slot; the wrapper no longer makes a separate HBM pass to cast state).
    x = x_ref[...].astype(w1_ref.dtype)
    # linear1 + relu  (bf16 MXU operands, f32 accumulation + elementwise)
    h = jnp.dot(x, w1_ref[...], preferred_element_type=jnp.float32) + b1_ref[...]
    h = jnp.maximum(h, 0.0)
    # linear2 + relu
    h = h.astype(w2_ref.dtype)
    h = jnp.dot(h, w2_ref[...], preferred_element_type=jnp.float32) + b2_ref[...]
    h = jnp.maximum(h, 0.0)
    # fused heads: one [hidden, head_width] matmul producing [tb, head_width]
    # (head_width = 2*out zero-padded up to a multiple of 128 for lane-dense
    #  unmasked stores; padded columns are exactly zero).
    h = h.astype(wh_ref.dtype)
    heads = jnp.dot(h, wh_ref[...], preferred_element_type=jnp.float32) + bh_ref[...]
    mean_part = jnp.tanh(heads) * action_scale          # valid on lanes [0, out)
    logstd_part = jnp.clip(heads, -20.0, 2.0)           # valid on lanes [out, 2*out)
    lane = jax.lax.broadcasted_iota(jnp.int32, heads.shape, 1)
    # single lane-dense full-width store: [mean || log_std || zero padding]
    out_ref[...] = jnp.where(lane < out_size, mean_part, logstd_part)


def _choose_batch_tile(B):
    # Small batches (and the forced-kernel tiny path): one full-batch step.
    if B < 128:
        return B
    # B >= 128: pick the largest tile (capped at 4096 for v5e VMEM headroom)
    # that still yields >= 2 grid steps so v7x's two TensorCores both get
    # work; per-step overhead (~0.35us) is amortized by the big tiles.
    for cand in (4096, 2048, 1024, 512, 256, 128, 64):
        if pl.cdiv(B, cand) >= 2:
            return cand
    return B


def _xla_forward(state, params, action_scale=1.0):
    """Plain fused-XLA forward (reference + small-batch fast path)."""
    w1, b1, w2, b2, wm, bm, ws, bs = params
    x = jnp.maximum(state @ w1 + b1, 0.0)
    x = jnp.maximum(x @ w2 + b2, 0.0)
    mean = jnp.tanh(x @ wm + bm) * action_scale
    log_std = jnp.clip(x @ ws + bs, -20.0, 2.0)
    return mean, log_std


def gaussian_actor_forward(state, params, action_scale=1.0, *,
                           batch_tile=None, use_bf16=True,
                           force_kernel=False, small_batch_threshold=64):
    """Returns (mean, log_std), matching GaussianActor.forward."""
    w1, b1, w2, b2, wm, bm, ws, bs = params
    B, in_size = state.shape
    hidden = w1.shape[1]
    out_size = wm.shape[1]
    two_out = 2 * out_size

    # Tiny-batch fast path: pallas_call launch + single-step overhead exceeds
    # the whole network's compute at deployment shapes like B=8.
    if (not force_kernel) and batch_tile is None and B < small_batch_threshold:
        return _xla_forward(state, params, action_scale)

    tb = _choose_batch_tile(B) if batch_tile is None else int(batch_tile)
    assert tb == B or tb % 8 == 0, "batch_tile must be a multiple of 8 (or == B)"

    # Pad the batch up to a tile multiple (zero rows are harmless and sliced
    # off below) -- avoids single-giant-step fallback / VMEM blowups.
    B_pad = _round_up(B, tb)
    state_in = state if B_pad == B else jnp.pad(state, ((0, B_pad - B), (0, 0)))
    num_steps = B_pad // tb

    # Fused head, zero-padded to a lane-dense width (multiple of 128):
    # columns [0, out) = mean weights, [out, 2*out) = log_std weights, rest 0.
    head_width = max(128, _round_up(two_out, 128))
    wh = jnp.zeros((hidden, head_width), jnp.float32)
    wh = wh.at[:, :out_size].set(wm).at[:, out_size:two_out].set(ws)
    bh = jnp.zeros((1, head_width), jnp.float32)
    bh = bh.at[0, :out_size].set(bm).at[0, out_size:two_out].set(bs)

    b1r = b1.reshape(1, hidden).astype(jnp.float32)
    b2r = b2.reshape(1, hidden).astype(jnp.float32)

    # bf16 operands for the MXU; biases / accumulation / activations stay f32.
    # NOTE: state is NOT cast here -- the kernel casts its tile in-register.
    mm_dtype = jnp.bfloat16 if use_bf16 else jnp.float32
    w1c = w1.astype(mm_dtype)
    w2c = w2.astype(mm_dtype)
    whc = wh.astype(mm_dtype)

    kernel = functools.partial(_actor_kernel,
                               action_scale=float(action_scale),
                               out_size=out_size)

    full = lambda i: (0, 0)  # weights/biases: constant block index -> no re-DMA
    grid_spec = pltpu.PrefetchScalarGridSpec(
        num_scalar_prefetch=0,
        grid=(num_steps,),
        in_specs=[
            pl.BlockSpec((tb, in_size), lambda i: (i, 0)),   # state tile (f32)
            pl.BlockSpec((in_size, hidden), full),           # w1
            pl.BlockSpec((1, hidden), full),                 # b1
            pl.BlockSpec((hidden, hidden), full),            # w2
            pl.BlockSpec((1, hidden), full),                 # b2
            pl.BlockSpec((hidden, head_width), full),        # [w_mean||w_log_std||0]
            pl.BlockSpec((1, head_width), full),             # [b_mean||b_log_std||0]
        ],
        out_specs=pl.BlockSpec((tb, head_width), lambda i: (i, 0)),
    )

    def _nbytes(a):
        return int(a.size) * a.dtype.itemsize

    flops = 2 * B_pad * (in_size * hidden + hidden * hidden + hidden * head_width)
    bytes_accessed = (_nbytes(state_in) + _nbytes(w1c) + _nbytes(b1r)
                      + _nbytes(w2c) + _nbytes(b2r) + _nbytes(whc) + _nbytes(bh)
                      + B_pad * head_width * 4)
    cost = pl.CostEstimate(flops=flops,
                           transcendentals=B_pad * head_width,
                           bytes_accessed=bytes_accessed)

    out = pl.pallas_call(
        kernel,
        grid_spec=grid_spec,
        out_shape=jax.ShapeDtypeStruct((B_pad, head_width), jnp.float32),
        compiler_params=pltpu.CompilerParams(
            dimension_semantics=("parallel",),
            vmem_limit_bytes=32 * 1024 * 1024),   # big tiles also fit on v5e
        cost_estimate=cost,
    )(state_in, w1c, b1r, w2c, b2r, whc, bh)

    # Slice the lane-dense [mean || log_std || padding] slab in the wrapper.
    return out[:B, :out_size], out[:B, out_size:two_out]


def init_params(key, input_size, output_size, hidden_size=128):
    """xavier_normal weights + constant 0.1 biases (matches xavier_weights_init_).
    Weights stored as [in, out]."""
    def xavier(k, fan_in, fan_out):
        std = math.sqrt(2.0 / (fan_in + fan_out))
        return jax.random.normal(k, (fan_in, fan_out), jnp.float32) * std

    k1, k2, k3, k4 = jax.random.split(key, 4)
    w1 = xavier(k1, input_size, hidden_size)
    b1 = jnp.full((hidden_size,), 0.1, jnp.float32)
    w2 = xavier(k2, hidden_size, hidden_size)
    b2 = jnp.full((hidden_size,), 0.1, jnp.float32)
    wm = xavier(k3, hidden_size, output_size)
    bm = jnp.full((output_size,), 0.1, jnp.float32)
    ws = xavier(k4, hidden_size, output_size)
    bs = jnp.full((output_size,), 0.1, jnp.float32)
    return (w1, b1, w2, b2, wm, bm, ws, bs)


# TODO(synk): sample()/get_log_prob() (torch.distributions.Normal) are host-side
# sampling utilities, not part of the forward pass, and are left to plain JAX.

if __name__ == "__main__":
    key = jax.random.PRNGKey(0)
    k_param, k1, k2, k3 = jax.random.split(key, 4)

    input_size, output_size, hidden_size = 16, 8, 128
    action_scale = 1.0
    params = init_params(k_param, input_size, output_size, hidden_size)

    # 1) Tiny deployment batch (B=8): default path dispatches to fused XLA.
    state_small = jax.random.normal(k1, (8, input_size), jnp.float32)
    mean, log_std = gaussian_actor_forward(state_small, params, action_scale)
    jax.block_until_ready((mean, log_std))
    mean_ref, log_std_ref = _xla_forward(state_small, params, action_scale)
    assert mean.shape == (8, output_size) and log_std.shape == (8, output_size)
    assert jnp.allclose(mean, mean_ref, atol=1e-6, rtol=1e-6)
    assert jnp.allclose(log_std, log_std_ref, atol=1e-6, rtol=1e-6)

    # 2) Same tiny batch, forced through the Pallas kernel (f32 exact path).
    mean_k, log_std_k = gaussian_actor_forward(state_small, params, action_scale,
                                               use_bf16=False, force_kernel=True)
    jax.block_until_ready((mean_k, log_std_k))
    assert jnp.allclose(mean_k, mean_ref, atol=1e-5, rtol=1e-5)
    assert jnp.allclose(log_std_k, log_std_ref, atol=1e-5, rtol=1e-5)

    # 3) Larger batch: auto tile -> 2 "parallel" grid steps, bf16 matmuls.
    state_big = jax.random.normal(k2, (256, input_size), jnp.float32)
    mean_b, log_std_b = gaussian_actor_forward(state_big, params, action_scale)
    jax.block_until_ready((mean_b, log_std_b))
    mean_bref, log_std_bref = _xla_forward(state_big, params, action_scale)
    assert jnp.allclose(mean_b, mean_bref, atol=5e-2, rtol=5e-2)
    assert jnp.allclose(log_std_b, log_std_bref, atol=5e-2, rtol=5e-2)

    # 4) Non-divisible batch (B=200): exercises the pad-to-tile path (f32 exact).
    state_odd = jax.random.normal(k3, (200, input_size), jnp.float32)
    mean_o, log_std_o = gaussian_actor_forward(state_odd, params, action_scale,
                                               use_bf16=False)
    jax.block_until_ready((mean_o, log_std_o))
    mean_oref, log_std_oref = _xla_forward(state_odd, params, action_scale)
    assert mean_o.shape == (200, output_size)
    assert jnp.allclose(mean_o, mean_oref, atol=1e-5, rtol=1e-5)
    assert jnp.allclose(log_std_o, log_std_oref, atol=1e-5, rtol=1e-5)

    print("KERNEL_OK")
</pallas_src>

<mosaic_0001>
module attributes {stable_mosaic.version = 11 : i64} {
  func.func @_actor_kernel(%arg0: i32, %arg1: memref<8x16xf32, #tpu.memory_space<vmem>>, %arg2: memref<16x128xf32, #tpu.memory_space<vmem>>, %arg3: memref<1x128xf32, #tpu.memory_space<vmem>>, %arg4: memref<128x128xf32, #tpu.memory_space<vmem>>, %arg5: memref<1x128xf32, #tpu.memory_space<vmem>>, %arg6: memref<128x128xf32, #tpu.memory_space<vmem>>, %arg7: memref<1x128xf32, #tpu.memory_space<vmem>>, %arg8: memref<8x128xf32, #tpu.memory_space<vmem>>) attributes {dimension_semantics = [#tpu.dimension_semantics<parallel>], iteration_bounds = array<i64: 1>, scalar_prefetch = 0 : i64, scratch_operands = 0 : i64, tpu.core_type = #tpu.core_type<tc>, window_params = [{transform_indices = @transform_0, window_bounds = array<i64: 8, 16>}, {pipeline_mode = #tpu.pipeline_mode<synchronous>, transform_indices = @transform_1, window_bounds = array<i64: 16, 128>}, {pipeline_mode = #tpu.pipeline_mode<synchronous>, transform_indices = @transform_2, window_bounds = array<i64: 1, 128>}, {pipeline_mode = #tpu.pipeline_mode<synchronous>, transform_indices = @transform_3, window_bounds = array<i64: 128, 128>}, {pipeline_mode = #tpu.pipeline_mode<synchronous>, transform_indices = @transform_4, window_bounds = array<i64: 1, 128>}, {pipeline_mode = #tpu.pipeline_mode<synchronous>, transform_indices = @transform_5, window_bounds = array<i64: 128, 128>}, {pipeline_mode = #tpu.pipeline_mode<synchronous>, transform_indices = @transform_6, window_bounds = array<i64: 1, 128>}, {transform_indices = @transform_7, window_bounds = array<i64: 8, 128>}]} {
    %c0 = arith.constant 0 : index
    %c0_0 = arith.constant 0 : index
    %0 = vector.load %arg1[%c0, %c0_0] : memref<8x16xf32, #tpu.memory_space<vmem>>, vector<8x16xf32>
    %c0_1 = arith.constant 0 : index
    %c0_2 = arith.constant 0 : index
    %1 = vector.load %arg2[%c0_1, %c0_2] : memref<16x128xf32, #tpu.memory_space<vmem>>, vector<16x128xf32>
    %cst = arith.constant dense<0.000000e+00> : vector<8x128xf32>
    %2 = tpu.matmul %0, %1, %cst {dimension_numbers = #tpu.dot_dimension_numbers<[1], [0], [0], [1], [0, 0, 1, 1], [], []>} : vector<8x16xf32>, vector<16x128xf32>, vector<8x128xf32> -> vector<8x128xf32>
    %c0_3 = arith.constant 0 : index
    %c0_4 = arith.constant 0 : index
    %3 = vector.load %arg3[%c0_3, %c0_4] : memref<1x128xf32, #tpu.memory_space<vmem>>, vector<1x128xf32>
    %4 = vector.broadcast %3 : vector<1x128xf32> to vector<8x128xf32>
    %5 = arith.addf %2, %4 : vector<8x128xf32>
    %cst_5 = arith.constant 0.000000e+00 : f32
    %6 = vector.broadcast %cst_5 : f32 to vector<8x128xf32>
    %7 = arith.maximumf %5, %6 : vector<8x128xf32>
    %c0_6 = arith.constant 0 : index
    %c0_7 = arith.constant 0 : index
    %8 = vector.load %arg4[%c0_6, %c0_7] : memref<128x128xf32, #tpu.memory_space<vmem>>, vector<128x128xf32>
    %cst_8 = arith.constant dense<0.000000e+00> : vector<8x128xf32>
    %9 = tpu.matmul %7, %8, %cst_8 {dimension_numbers = #tpu.dot_dimension_numbers<[1], [0], [0], [1], [0, 0, 1, 1], [], []>} : vector<8x128xf32>, vector<128x128xf32>, vector<8x128xf32> -> vector<8x128xf32>
    %c0_9 = arith.constant 0 : index
    %c0_10 = arith.constant 0 : index
    %10 = vector.load %arg5[%c0_9, %c0_10] : memref<1x128xf32, #tpu.memory_space<vmem>>, vector<1x128xf32>
    %11 = vector.broadcast %10 : vector<1x128xf32> to vector<8x128xf32>
    %12 = arith.addf %9, %11 : vector<8x128xf32>
    %cst_11 = arith.constant 0.000000e+00 : f32
    %13 = vector.broadcast %cst_11 : f32 to vector<8x128xf32>
    %14 = arith.maximumf %12, %13 : vector<8x128xf32>
    %c0_12 = arith.constant 0 : index
    %c0_13 = arith.constant 0 : index
    %15 = vector.load %arg6[%c0_12, %c0_13] : memref<128x128xf32, #tpu.memory_space<vmem>>, vector<128x128xf32>
    %cst_14 = arith.constant dense<0.000000e+00> : vector<8x128xf32>
    %16 = tpu.matmul %14, %15, %cst_14 {dimension_numbers = #tpu.dot_dimension_numbers<[1], [0], [0], [1], [0, 0, 1, 1], [], []>} : vector<8x128xf32>, vector<128x128xf32>, vector<8x128xf32> -> vector<8x128xf32>
    %c0_15 = arith.constant 0 : index
    %c0_16 = arith.constant 0 : index
    %17 = vector.load %arg7[%c0_15, %c0_16] : memref<1x128xf32, #tpu.memory_space<vmem>>, vector<1x128xf32>
    %18 = vector.broadcast %17 : vector<1x128xf32> to vector<8x128xf32>
    %19 = arith.addf %16, %18 : vector<8x128xf32>
    %20 = math.tanh %19 : vector<8x128xf32>
    %cst_17 = arith.constant 1.000000e+00 : f32
    %21 = vector.broadcast %cst_17 : f32 to vector<8x128xf32>
    %22 = arith.mulf %20, %21 : vector<8x128xf32>
    %cst_18 = arith.constant -2.000000e+01 : f32
    %cst_19 = arith.constant 2.000000e+00 : f32
    %23 = vector.broadcast %cst_18 : f32 to vector<8x128xf32>
    %24 = arith.maximumf %23, %19 : vector<8x128xf32>
    %25 = vector.broadcast %cst_19 : f32 to vector<8x128xf32>
    %26 = arith.minimumf %25, %24 : vector<8x128xf32>
    %27 = tpu.iota {dimensions = array<i32: 1>} : vector<8x128xi32>
    %c8_i32 = arith.constant 8 : i32
    %28 = vector.broadcast %c8_i32 : i32 to vector<8x128xi32>
    %29 = arith.cmpi slt, %27, %28 : vector<8x128xi32>
    %30 = arith.select %29, %22, %26 : vector<8x128xi1>, vector<8x128xf32>
    %c0_20 = arith.constant 0 : index
    %c0_21 = arith.constant 0 : index
    %31 = vector.load %arg8[%c0_20, %c0_21] : memref<8x128xf32, #tpu.memory_space<vmem>>, vector<8x128xf32>
    tpu.vector_store %arg8[%c0_20, %c0_21], %30 {strides = array<i32>} : memref<8x128xf32, #tpu.memory_space<vmem>>, vector<8x128xf32>,
    return
  }
  func.func @transform_0(%arg0: i32) -> (i32, i32) {
    %c0_i32 = arith.constant 0 : i32
    %c0_i32_0 = arith.constant 0 : i32
    return %arg0, %c0_i32 : i32, i32
  }
  func.func @transform_1(%arg0: i32) -> (i32, i32) {
    %c0_i32 = arith.constant 0 : i32
    %c0_i32_0 = arith.constant 0 : i32
    %c0_i32_1 = arith.constant 0 : i32
    return %c0_i32, %c0_i32_0 : i32, i32
  }
  func.func @transform_2(%arg0: i32) -> (i32, i32) {
    %c0_i32 = arith.constant 0 : i32
    %c0_i32_0 = arith.constant 0 : i32
    %c0_i32_1 = arith.constant 0 : i32
    return %c0_i32, %c0_i32_0 : i32, i32
  }
  func.func @transform_3(%arg0: i32) -> (i32, i32) {
    %c0_i32 = arith.constant 0 : i32
    %c0_i32_0 = arith.constant 0 : i32
    %c0_i32_1 = arith.constant 0 : i32
    return %c0_i32, %c0_i32_0 : i32, i32
  }
  func.func @transform_4(%arg0: i32) -> (i32, i32) {
    %c0_i32 = arith.constant 0 : i32
    %c0_i32_0 = arith.constant 0 : i32
    %c0_i32_1 = arith.constant 0 : i32
    return %c0_i32, %c0_i32_0 : i32, i32
  }
  func.func @transform_5(%arg0: i32) -> (i32, i32) {
    %c0_i32 = arith.constant 0 : i32
    %c0_i32_0 = arith.constant 0 : i32
    %c0_i32_1 = arith.constant 0 : i32
    return %c0_i32, %c0_i32_0 : i32, i32
  }
  func.func @transform_6(%arg0: i32) -> (i32, i32) {
    %c0_i32 = arith.constant 0 : i32
    %c0_i32_0 = arith.constant 0 : i32
    %c0_i32_1 = arith.constant 0 : i32
    return %c0_i32, %c0_i32_0 : i32, i32
  }
  func.func @transform_7(%arg0: i32) -> (i32, i32) {
    %c0_i32 = arith.constant 0 : i32
    %c0_i32_0 = arith.constant 0 : i32
    return %arg0, %c0_i32 : i32, i32
  }
}

</mosaic_0001>

<bundles_post_ra>
// kernel: tpu_custom_call.1
= control target key start
LH: loop header
LB: loop body
LE: loop exit
PB: predicated region body
PF: predicated region fallthrough
CT: control target
= control target key end

     0   :  { %12 = vsyncpa [#allocation3], 0  ;;  %s736_s0 = inlined_call_operand.hbm [shape: f32[8,16], index: 0, kind: input, shape index: {}]   ;;  %s737_s1 = inlined_call_operand.hbm [shape: f32[16,128], index: 1, kind: input, shape index: {}]   ;;  %s738_s2 = inlined_call_operand.vmem [shape: f32[1,128], index: 2, kind: input, shape index: {}]   ;;  %s739_s3 = inlined_call_operand.hbm [shape: f32[128,128], index: 3, kind: input, shape index: {}]   ;;  %s740_s4 = inlined_call_operand.vmem [shape: f32[1,128], index: 4, kind: input, shape index: {}]   ;;  %s741_s5 = inlined_call_operand.hbm [shape: f32[128,128], index: 5, kind: input, shape index: {}]   ;;  %s742_s6 = inlined_call_operand.vmem [shape: f32[1,128], index: 6, kind: input, shape index: {}]   ;;  %s743_s7 = inlined_call_operand.hbm [shape: f32[8,128], index: 7, kind: output, shape index: {}]  }
   0x1   :  { %13 = vsyncpa [#allocation6], 0 }
   0x2   :  { %14 = vsyncpa [#allocation9], 0 }
   0x3   :  { %15 = vsyncpa [#allocation4], 0  ;;  %s614_s24 = smov [#allocation5]  }
   0x4   :  { %s31_s25 = sshll.u32 %s614_s24, 4  ;;  %s32_s25 = int_to_ptr.vmem [resolvable:$true] %s31_s25 }
   0x5   :  { %s514_s26 = scalar_lea.vmem %s32_s25, 256  ;;  %p519_p1 = scmp.lt.s32.totalorder %s32_s25, %s32_s25 }
   0x6   :  { %p515_p0 = scmp.ne.s32.totalorder %s32_s25, %s514_s26  ;;  %p520_p2 = scmp.lt.s32.totalorder %s514_s26, %s514_s26 }
   0x8   :  { %p521_p3 = por %p520_p2, %p519_p1 }
   0xa   :  { %p522_p4 = pnand %p521_p3, %p515_p0 }
   0xc   :  { %525 = shalt.err (!%p522_p4)
}
   0xd   :  { %s615_s27 = smov 128   ;;  %s616_s28 = smov 8  }
   0xe   :  { %37 = dma.hbm_to_vmem [thread:$0]  %s737_s1, 256, %s32_s25, [#allocation6], %s615_s27, %s615_s27, %s616_s28  }
   0xf   :  { %s617_s8 = smov [#allocation2]   ;;  %s618_s10 = smov [#allocation7]  }
  0x10   :  { %s22_s9 = sshll.u32 %s617_s8, 4  ;;  %s45_s11 = sshll.u32 %s618_s10, 4  ;;  %s23_s9 = int_to_ptr.vmem [resolvable:$true] %s22_s9  ;;  %s46_s11 = int_to_ptr.vmem [resolvable:$true] %s45_s11 }
  0x11   :  { %s534_s12 = scalar_lea.vmem %s23_s9, 128  ;;  %p539_p6 = scmp.lt.s32.totalorder %s23_s9, %s23_s9 }
  0x12   :  { %p535_p5 = scmp.ne.s32.totalorder %s23_s9, %s534_s12  ;;  %p540_p7 = scmp.lt.s32.totalorder %s534_s12, %s534_s12 }
  0x14   :  { %p541_p8 = por %p540_p7, %p539_p6 }
  0x16   :  { %p542_p9 = pnand %p541_p8, %p535_p5 }
  0x18   :  { %545 = shalt.err (!%p542_p9)
}
  0x19   :  { %25 = dma.hbm_to_vmem [thread:$0]  %s736_s0, 128, %s23_s9, [#allocation3]  }
  0x1a   :  { %s554_s15 = scalar_lea.vmem %s46_s11, 2048  ;;  %p559_p11 = scmp.lt.s32.totalorder %s46_s11, %s46_s11 }
  0x1b   :  { %p555_p10 = scmp.ne.s32.totalorder %s46_s11, %s554_s15  ;;  %p560_p12 = scmp.lt.s32.totalorder %s554_s15, %s554_s15 }
  0x1d   :  { %p561_p13 = por %p560_p12, %p559_p11 }
  0x1f   :  { %p562_p0 = pnand %p561_p13, %p555_p10 }
  0x21   :  { %565 = shalt.err (!%p562_p0)
}
  0x22   :  { %51 = dma.hbm_to_vmem [thread:$0]  %s739_s3, 2048, %s46_s11, [#allocation6], %s615_s27, %s615_s27, %s616_s28  }
  0x23   :  { %s619_s17 = smov [#allocation8]  }
  0x24   :  { %s59_s18 = sshll.u32 %s619_s17, 4  ;;  %s60_s18 = int_to_ptr.vmem [resolvable:$true] %s59_s18 }
  0x25   :  { %s574_s19 = scalar_lea.vmem %s60_s18, 2048  ;;  %p579_p2 = scmp.lt.s32.totalorder %s60_s18, %s60_s18 }
  0x26   :  { %p575_p1 = scmp.ne.s32.totalorder %s60_s18, %s574_s19  ;;  %p580_p3 = scmp.lt.s32.totalorder %s574_s19, %s574_s19 }
  0x28   :  { %p581_p4 = por %p580_p3, %p579_p2 }
  0x2a   :  { %p582_p5 = pnand %p581_p4, %p575_p1 }
  0x2c   :  { %585 = shalt.err (!%p582_p5)
}
  0x2d   :  { %65 = dma.hbm_to_vmem [thread:$0]  %s741_s5, 2048, %s60_s18, [#allocation9], %s615_s27, %s615_s27, %s616_s28  }
  0x2e   :  { %606 = dma.done.wait [#allocation3], 128  }
  0x2f   :  { %607 = vsyncadd [#allocation3], 4294967168 }
  0x30   :  { %608 = dma.done.wait [#allocation6], 2304  }
  0x31   :  { %609 = vsyncadd [#allocation6], 4294964992 }
  0x32   :  { %610 = dma.done.wait [#allocation9], 2048  }
  0x33   :  { %611 = vsyncadd [#allocation9], 4294965248  ;;  %v620_v0 = vmov 0.0   ;;  %vm621_vm0 = vmmov 0   ;;  %v82_v1 = vld [vmem:[#allocation5 + $0x8] sm:$0xff]  ;;  %v81_v2 = vld [vmem:[#allocation5] sm:$0xff]  ;;  %v355_v50 = vlaneseq }
  0x34   :  { %418 = vmatprep.subr.mxu0 %v620_v0  ;;  %422 = vmatprep.mubr.msk.f32.mxu0 %vm621_vm0, %v620_v0  ;;  %v80_v3 = vld [vmem:[#allocation2] sm:$0xff]  ;;  %vm90_vm1 = vcmask 130048   ;;  %v180_v4 = vld [vmem:[#allocation7 + $0x78] sm:$0xff]  ;;  %v179_v5 = vld [vmem:[#allocation7 + $0x70] sm:$0xff]  ;;  %s622_s24 = smov [#allocation10]  }
  0x35   :  { %425 = vmatprep.subr.mxu1 %v620_v0  ;;  %457 = vmatprep.mubr.msk.f32.mxu1 %vm621_vm0, %v620_v0  ;;  %v178_v6 = vld [vmem:[#allocation7 + $0x68] sm:$0xff]  ;;  %v177_v7 = vld [vmem:[#allocation7 + $0x60] sm:$0xff]  ;;  %v176_v8 = vld [vmem:[#allocation7 + $0x58] sm:$0xff]  ;;  %v356_v51 = vand.u32 127, %v355_v50  ;;  %s366_s25 = sshll.u32 %s622_s24, 4  ;;  %s367_s25 = int_to_ptr.vmem [resolvable:$true] %s366_s25 }
  0x36   :  { %419 = vmatpush3.msra.mxu0 %v82_v1  ;;  %426 = vmatpush3.msra.mxu1 %v180_v4  ;;  %v175_v9 = vld [vmem:[#allocation7 + $0x50] sm:$0xff]  ;;  %v174_v10 = vld [vmem:[#allocation7 + $0x48] sm:$0xff]  ;;  %v173_v11 = vld [vmem:[#allocation7 + $0x40] sm:$0xff]  ;;  %p591_p7 = scmp.lt.s32.totalorder %s367_s25, %s367_s25 }
  0x37   :  { %420 = vmatprep.subr.mxu0 %v620_v0  ;;  %427 = vmatprep.subr.mxu1 %v620_v0  ;;  %v172_v12 = vld [vmem:[#allocation7 + $0x38] sm:$0xff]  ;;  %v171_v13 = vld [vmem:[#allocation7 + $0x30] sm:$0xff]  ;;  %v170_v14 = vld [vmem:[#allocation7 + $0x28] sm:$0xff]  ;;  %vm357_vm2 = vcmp.lt.s32.totalorder %v356_v51, 8 }
  0x38   :  { %421 = vmatpush3.msra.mxu0 %v81_v2  ;;  %428 = vmatpush3.msra.mxu1 %v179_v5  ;;  %v169_v15 = vld [vmem:[#allocation7 + $0x20] sm:$0xff]  ;;  %v168_v16 = vld [vmem:[#allocation7 + $0x18] sm:$0xff]  ;;  %v167_v17 = vld [vmem:[#allocation7 + $0x10] sm:$0xff] }
  0x39   :  { %423 = vmatmul.mubr.msk.f32.vlgmr.msra.gmra.mxu0 %vm90_vm1, %v80_v3  ;;  %429 = vmatprep.subr.mxu1 %v620_v0  ;;  %v166_v18 = vld [vmem:[#allocation7 + $0x8] sm:$0xff]  ;;  %v165_v19 = vld [vmem:[#allocation7] sm:$0xff]  ;;  %v274_v20 = vld [vmem:[#allocation8 + $0x78] sm:$0xff] }
  0x3a   :  { %460 = vmatprep.subr.mxu0 %v620_v0  ;;  %430 = vmatpush3.msra.mxu1 %v178_v6  ;;  %v273_v21 = vld [vmem:[#allocation8 + $0x70] sm:$0xff]  ;;  %v272_v22 = vld [vmem:[#allocation8 + $0x68] sm:$0xff]  ;;  %v271_v23 = vld [vmem:[#allocation8 + $0x60] sm:$0xff] }
  0x3b   :  { %492 = vmatprep.mubr.msk.f32.mxu0 %vm621_vm0, %v620_v0  ;;  %431 = vmatprep.subr.mxu1 %v620_v0  ;;  %v270_v24 = vld [vmem:[#allocation8 + $0x58] sm:$0xff]  ;;  %v269_v25 = vld [vmem:[#allocation8 + $0x50] sm:$0xff]  ;;  %v268_v26 = vld [vmem:[#allocation8 + $0x48] sm:$0xff] }
  0x3c   :  { %432 = vmatpush3.msra.mxu1 %v177_v7  ;;  %461 = vmatpush3.msra.mxu0 %v274_v20  ;;  %v267_v27 = vld [vmem:[#allocation8 + $0x40] sm:$0xff]  ;;  %v266_v28 = vld [vmem:[#allocation8 + $0x38] sm:$0xff]  ;;  %v265_v29 = vld [vmem:[#allocation8 + $0x30] sm:$0xff] }
  0x3d   :  { %433 = vmatprep.subr.mxu1 %v620_v0  ;;  %462 = vmatprep.subr.mxu0 %v620_v0  ;;  %v264_v30 = vld [vmem:[#allocation8 + $0x28] sm:$0xff]  ;;  %v263_v31 = vld [vmem:[#allocation8 + $0x20] sm:$0xff]  ;;  %v262_v32 = vld [vmem:[#allocation8 + $0x18] sm:$0xff] }
  0x3e   :  { %434 = vmatpush3.msra.mxu1 %v176_v8  ;;  %463 = vmatpush3.msra.mxu0 %v273_v21  ;;  %v377_v33 = vld [vmem:[%s738_s2] ss:$0 sm:$0xff]  ;;  %v261_v38 = vld [vmem:[#allocation8 + $0x10] sm:$0xff]  ;;  %v259_v40 = vld [vmem:[#allocation8] sm:$0xff] }
  0x3f   :  { %435 = vmatprep.subr.mxu1 %v620_v0  ;;  %464 = vmatprep.subr.mxu0 %v620_v0  ;;  %v260_v39 = vld [vmem:[#allocation8 + $0x8] sm:$0xff] }
  0x40   :  { %436 = vmatpush3.msra.mxu1 %v175_v9  ;;  %465 = vmatpush3.msra.mxu0 %v272_v22  ;;  %v379_v41 = vld [vmem:[%s740_s4] ss:$0 sm:$0xff]  ;;  %s586_s4 = scalar_lea.vmem %s367_s25, 128 }
  0x41   :  { %437 = vmatprep.subr.mxu1 %v620_v0  ;;  %466 = vmatprep.subr.mxu0 %v620_v0  ;;  %v380_v46 = vld [vmem:[%s742_s6] ss:$0 sm:$0xff]  ;;  %p587_p6 = scmp.ne.s32.totalorder %s367_s25, %s586_s4  ;;  %p592_p8 = scmp.lt.s32.totalorder %s586_s4, %s586_s4 }
  0x42   :  { %438 = vmatpush3.msra.mxu1 %v174_v10  ;;  %467 = vmatpush3.msra.mxu0 %v271_v23 }
  0x43   :  { %439 = vmatprep.subr.mxu1 %v620_v0  ;;  %468 = vmatprep.subr.mxu0 %v620_v0  ;;  %p593_p9 = por %p592_p8, %p591_p7 }
  0x44   :  { %440 = vmatpush3.msra.mxu1 %v173_v11  ;;  %469 = vmatpush3.msra.mxu0 %v270_v24 }
  0x45   :  { %441 = vmatprep.subr.mxu1 %v620_v0  ;;  %470 = vmatprep.subr.mxu0 %v620_v0  ;;  %p594_p10 = pnand %p593_p9, %p587_p6 }
  0x46   :  { %442 = vmatpush3.msra.mxu1 %v172_v12  ;;  %471 = vmatpush3.msra.mxu0 %v269_v25 }
  0x47   :  { %443 = vmatprep.subr.mxu1 %v620_v0  ;;  %472 = vmatprep.subr.mxu0 %v620_v0 }
  0x48   :  { %444 = vmatpush3.msra.mxu1 %v171_v13  ;;  %473 = vmatpush3.msra.mxu0 %v268_v26 }
  0x49   :  { %445 = vmatprep.subr.mxu1 %v620_v0  ;;  %474 = vmatprep.subr.mxu0 %v620_v0 }
  0x4a   :  { %446 = vmatpush3.msra.mxu1 %v170_v14  ;;  %475 = vmatpush3.msra.mxu0 %v267_v27 }
  0x4b   :  { %447 = vmatprep.subr.mxu1 %v620_v0  ;;  %476 = vmatprep.subr.mxu0 %v620_v0 }
  0x4c   :  { %448 = vmatpush3.msra.mxu1 %v169_v15  ;;  %477 = vmatpush3.msra.mxu0 %v266_v28 }
  0x4d   :  { %449 = vmatprep.subr.mxu1 %v620_v0  ;;  %478 = vmatprep.subr.mxu0 %v620_v0 }
  0x4e   :  { %450 = vmatpush3.msra.mxu1 %v168_v16  ;;  %479 = vmatpush3.msra.mxu0 %v265_v29 }
  0x4f   :  { %451 = vmatprep.subr.mxu1 %v620_v0  ;;  %480 = vmatprep.subr.mxu0 %v620_v0 }
  0x50   :  { %452 = vmatpush3.msra.mxu1 %v167_v17  ;;  %481 = vmatpush3.msra.mxu0 %v264_v30 }
  0x51   :  { %453 = vmatprep.subr.mxu1 %v620_v0  ;;  %482 = vmatprep.subr.mxu0 %v620_v0 }
  0x52   :  { %454 = vmatpush3.msra.mxu1 %v166_v18  ;;  %483 = vmatpush3.msra.mxu0 %v263_v31 }
  0x53   :  { %455 = vmatprep.subr.mxu1 %v620_v0  ;;  %484 = vmatprep.subr.mxu0 %v620_v0 }
  0x54   :  { %456 = vmatpush3.msra.mxu1 %v165_v19  ;;  %485 = vmatpush3.msra.mxu0 %v262_v32 }
  0x55   :  { %486 = vmatprep.subr.mxu0 %v620_v0 }
  0x56   :  { %487 = vmatpush3.msra.mxu0 %v261_v38 }
  0x57   :  { %488 = vmatprep.subr.mxu0 %v620_v0 }
  0x58   :  { %489 = vmatpush3.msra.mxu0 %v260_v39 }
  0x59   :  { %490 = vmatprep.subr.mxu0 %v620_v0 }
  0x5a   :  { %491 = vmatpush3.msra.mxu0 %v259_v40 }
  0xf9   :  { %v160_v34 = vpop.f32.mrf.mxu0 }
  0xfa   :  { %v161_v35 = vadd.f32 %v377_v33, %v160_v34 }
  0xfb   :  { %v424_v36 = vpop.f32.mrf.mxu0 }
  0xfc   :  { %v164_v37 = vmax.f32 %v161_v35, 0.0 }
  0xfe   :  { %458 = vmatmul.mubr.f32.vlgmr.msra.gmra.mxu1 %v164_v37 }
 0x1be   :  { %v254_v42 = vpop.f32.mrf.mxu1 }
 0x1bf   :  { %v255_v43 = vadd.f32 %v379_v41, %v254_v42 }
 0x1c0   :  { %v459_v44 = vpop.f32.mrf.mxu1 }
 0x1c1   :  { %v258_v45 = vmax.f32 %v255_v43, 0.0 }
 0x1c3   :  { %493 = vmatmul.mubr.f32.vlgmr.msra.gmra.mxu0 %v258_v45 }
 0x283   :  { %v348_v47 = vpop.f32.mrf.mxu0 }
 0x284   :  { %v349_v48 = vadd.f32 %v380_v46, %v348_v47 }
 0x285   :  { %v494_v49 = vpop.f32.mrf.mxu0 }
 0x286   :  { %504 = vtanh.f32 %v349_v48  ;;  %v353_v52 = vmax.f32 %v349_v48, -20.0 }
 0x288   :  { %v354_v53 = vmin.f32 %v353_v52, 2.0 }
 0x293   :  { %v505_v54 = vpop.eup %504 }
 0x294   :  { %v358_v55 = vsel %vm357_vm2, %v505_v54, %v354_v53 }
 0x295   :  { %359 = vst [vmem:[#allocation10] sm:$0xff] %v358_v55 }
 0x296   :  { %597 = shalt.err (!%p594_p10)
}
 0x297   :  { %369 = dma.vmem_to_hbm [thread:$0]  %s367_s25, 128, %s743_s7, [#allocation4]  }
 0x298   :  { %612 = dma.done.wait [#allocation4], 128  }
 0x299   :  { %613 = vsyncadd [#allocation4], 4294967168 }
 0x29a   :  { %373 = vsyncpa [#allocation3], 1 }
 0x29b   :  { %374 = vsyncpa [#allocation6], 1 }
 0x29c   :  { %375 = vsyncpa [#allocation9], 1 }
 0x29d   :  { %376 = vsyncpa [#allocation4], 1 }

</bundles_post_ra>
